<compile_context>
chip_gen: v7x
topology: tpu7x:2x2x1
jax: 0.10.0
libtpu: 0.0.40
codegen_flags: <defaults>
</compile_context>

<pallas_src>
import functools

import jax
import jax.numpy as jnp
from jax.experimental import pallas as pl
from jax.experimental.pallas import tpu as pltpu


def _round_up(x, m):
    return ((x + m - 1) // m) * m


def _pick_tile(n_pad, cap):
    """Largest multiple of 128 that divides n_pad and is <= cap (>= 128)."""
    cap = max(128, min(cap, n_pad))
    t = cap - (cap % 128)
    while t > 128 and n_pad % t != 0:
        t -= 128
    return max(t, 128)


def _hardware_caps():
    """(tm_cap, tk_cap, vmem_limit_bytes) per TPU generation.

    v5e/v6e: 128 MiB physical VMEM -> big adjacency tiles (fewer ~0.35us grid
    steps, fewer p re-reads).  v7x has only 64 MiB physical VMEM -> cap at
    2048x2048 (~20 MiB scoped).  Unknown/interpret backends use the
    conservative config.
    """
    kind = ""
    try:
        kind = jax.devices()[0].device_kind.lower()
    except Exception:
        pass
    if "v5" in kind or "v6" in kind:
        return 4096, 2048, 96 * 1024 * 1024
    return 2048, 2048, 48 * 1024 * 1024


# ----------------------------------------------------------------------------
# Kernels
# ----------------------------------------------------------------------------
def _proj_kernel(h_ref, w_ref, o_ref):
    # p = h @ W  (layer-0 feature projection), bf16 in, f32 accumulate.
    o_ref[...] = jnp.dot(
        h_ref[...], w_ref[...], preferred_element_type=jnp.float32
    ).astype(o_ref.dtype)


def _prop_fused_kernel(adj_ref, p_ref, b_ref, w_next_ref, o_ref, acc_ref):
    # acc = A_hat @ p   (f32 accumulate over the k grid axis)
    # epilogue: p_next = relu(acc + b) @ W_next     (next layer's projection)
    k = pl.program_id(1)

    @pl.when(k == 0)
    def _():
        acc_ref[...] = jnp.zeros_like(acc_ref)

    acc_ref[...] += jnp.dot(
        adj_ref[...], p_ref[...], preferred_element_type=jnp.float32
    )

    @pl.when(k == pl.num_programs(1) - 1)
    def _():
        act = jnp.maximum(acc_ref[...] + b_ref[...], 0.0).astype(jnp.bfloat16)
        o_ref[...] = jnp.dot(
            act, w_next_ref[...], preferred_element_type=jnp.float32
        ).astype(o_ref.dtype)


def _prop_final_kernel(adj_ref, p_ref, b_ref, o_ref, acc_ref, *, num_classes):
    # acc = A_hat @ p; epilogue: masked log_softmax over the real class lanes.
    k = pl.program_id(1)

    @pl.when(k == 0)
    def _():
        acc_ref[...] = jnp.zeros_like(acc_ref)

    acc_ref[...] += jnp.dot(
        adj_ref[...], p_ref[...], preferred_element_type=jnp.float32
    )

    @pl.when(k == pl.num_programs(1) - 1)
    def _():
        logits = acc_ref[...] + b_ref[...]
        lane = jax.lax.broadcasted_iota(jnp.int32, logits.shape, 1)
        # NOTE: -1e30 is a Python literal (a jnp scalar here would be a
        # captured constant and break pallas_call tracing).
        logits = jnp.where(lane < num_classes, logits, -1e30)
        m = jnp.max(logits, axis=1, keepdims=True)
        s = logits - m
        lse = jnp.log(jnp.sum(jnp.exp(s), axis=1, keepdims=True))
        o_ref[...] = (s - lse).astype(o_ref.dtype)


# ----------------------------------------------------------------------------
# pallas_call wrappers
# ----------------------------------------------------------------------------
def _project(h, w, *, tm, vmem_limit):
    n_pad, d_in = h.shape
    d_out = w.shape[1]
    return pl.pallas_call(
        _proj_kernel,
        out_shape=jax.ShapeDtypeStruct((n_pad, d_out), jnp.bfloat16),
        grid_spec=pltpu.PrefetchScalarGridSpec(
            num_scalar_prefetch=0,
            grid=(n_pad // tm,),
            in_specs=[
                pl.BlockSpec((tm, d_in), lambda i: (i, 0)),
                pl.BlockSpec((d_in, d_out), lambda i: (0, 0)),
            ],
            out_specs=pl.BlockSpec((tm, d_out), lambda i: (i, 0)),
        ),
        compiler_params=pltpu.CompilerParams(
            dimension_semantics=("parallel",),
            vmem_limit_bytes=vmem_limit,
        ),
    )(h, w)


def _propagate(adj, p, b2d, w_next, *, tm, tk, num_classes, vmem_limit):
    """One GCN propagation layer.

    If w_next is not None the next layer's projection is fused into the
    epilogue (output is bf16 p_next); otherwise this is the final layer and
    the epilogue emits f32 log_softmax logits.
    """
    n_pad = adj.shape[0]
    d_mid = p.shape[1]
    last = w_next is None

    if last:
        kernel = functools.partial(_prop_final_kernel, num_classes=num_classes)
        d_out, out_dtype = d_mid, jnp.float32
        in_specs = [
            pl.BlockSpec((tm, tk), lambda i, k: (i, k)),
            pl.BlockSpec((tk, d_mid), lambda i, k: (k, 0)),
            pl.BlockSpec((1, d_mid), lambda i, k: (0, 0)),
        ]
        args = (adj, p, b2d)
    else:
        kernel = _prop_fused_kernel
        d_out, out_dtype = w_next.shape[1], jnp.bfloat16
        in_specs = [
            pl.BlockSpec((tm, tk), lambda i, k: (i, k)),
            pl.BlockSpec((tk, d_mid), lambda i, k: (k, 0)),
            pl.BlockSpec((1, d_mid), lambda i, k: (0, 0)),
            pl.BlockSpec((d_mid, d_out), lambda i, k: (0, 0)),
        ]
        args = (adj, p, b2d, w_next)

    return pl.pallas_call(
        kernel,
        out_shape=jax.ShapeDtypeStruct((n_pad, d_out), out_dtype),
        grid_spec=pltpu.PrefetchScalarGridSpec(
            num_scalar_prefetch=0,
            grid=(n_pad // tm, n_pad // tk),
            in_specs=in_specs,
            out_specs=pl.BlockSpec((tm, d_out), lambda i, k: (i, 0)),
            scratch_shapes=[pltpu.VMEM((tm, d_mid), jnp.float32)],
        ),
        compiler_params=pltpu.CompilerParams(
            dimension_semantics=("parallel", "arbitrary"),
            vmem_limit_bytes=vmem_limit,
        ),
    )(*args)


# ----------------------------------------------------------------------------
# Glue: normalized adjacency (built once, outside the forward path) + layers
# ----------------------------------------------------------------------------
def build_normalized_adjacency(edge_index, num_nodes):
    """Dense bf16 A_hat[target, source] = D^{-1/2}(A+I)D^{-1/2}, padded to 128."""
    n_pad = _round_up(num_nodes, 128)
    row = edge_index[0].astype(jnp.int32)  # source
    col = edge_index[1].astype(jnp.int32)  # target
    self_idx = jnp.arange(num_nodes, dtype=jnp.int32)
    row = jnp.concatenate([row, self_idx])
    col = jnp.concatenate([col, self_idx])
    ones = jnp.ones(row.shape[0], jnp.float32)
    deg = jnp.zeros((num_nodes,), jnp.float32).at[col].add(ones)
    deg_inv_sqrt = jnp.where(deg > 0, jax.lax.rsqrt(deg), 0.0)
    vals = deg_inv_sqrt[row] * deg_inv_sqrt[col]
    adj = jnp.zeros((n_pad, n_pad), jnp.float32).at[col, row].add(vals)
    return adj.astype(jnp.bfloat16)


def _pad2(a, rows, cols):
    return jnp.pad(a, ((0, rows - a.shape[0]), (0, cols - a.shape[1])))


def gnn_forward(x, adj, weights, biases, *, tm_cap=None, tk_cap=None):
    """Full-batch GCN forward.

    x: [N, F] float, adj: [N_pad, N_pad] bf16 pre-built normalized adjacency
    (see build_normalized_adjacency), weights[i]: [D_in, D_out], biases[i]:
    [D_out].  Returns [N, num_classes] log-probabilities.
    """
    n = x.shape[0]
    n_pad = adj.shape[0]
    num_layers = len(weights)
    num_classes = weights[-1].shape[1]

    hw_tm, hw_tk, vmem_limit = _hardware_caps()
    tm_cap = hw_tm if tm_cap is None else tm_cap
    tk_cap = hw_tk if tk_cap is None else tk_cap

    # Row tile: keep >= 2 row blocks when possible so the "parallel" axis can
    # shard across TensorCores; k tile: as big as the cap / n_pad allow.
    tm = _pick_tile(n_pad, min(tm_cap, max(128, n_pad // 2)))
    tk = _pick_tile(n_pad, tk_cap)

    # Pad/cast per-layer parameters (lane-dense d_out; d_in stays unpadded for
    # layer 0, and equals the previous padded d_out for layers > 0).
    d_outs_p = [_round_up(w.shape[1], 128) for w in weights]
    w_p, b_p = [], []
    for li, (w, b) in enumerate(zip(weights, biases)):
        d_in, d_out = w.shape
        d_in_p = d_in if li == 0 else d_outs_p[li - 1]
        d_out_p = d_outs_p[li]
        w_p.append(_pad2(w.astype(jnp.float32), d_in_p, d_out_p).astype(jnp.bfloat16))
        b_p.append(
            jnp.pad(b.astype(jnp.float32), (0, d_out_p - d_out)).reshape(1, d_out_p)
        )

    # Layer-0 projection (standalone; later projections are fused into the
    # previous layer's propagation epilogue).  Its row tile is sized off d_in
    # so wide-feature inputs cannot blow the projection's VMEM budget.
    d_in0 = x.shape[1]
    proj_row_cap = max(128, (4 * 1024 * 1024) // max(2 * d_in0, 1))
    tp = _pick_tile(n_pad, min(tm_cap, proj_row_cap))
    h = jnp.pad(x.astype(jnp.float32), ((0, n_pad - n), (0, 0))).astype(jnp.bfloat16)
    p = _project(h, w_p[0], tm=tp, vmem_limit=vmem_limit)

    # Propagation layers (ReLU + next projection fused; last = log_softmax).
    # TODO(synk): dropout is identity here (module default p=0 / eval mode).
    for li in range(num_layers):
        last = li == num_layers - 1
        p = _propagate(
            adj, p, b_p[li],
            None if last else w_p[li + 1],
            tm=tm, tk=tk,
            num_classes=num_classes,
            vmem_limit=vmem_limit,
        )

    return p[:n, :num_classes]


def _reference_forward(x, edge_index, weights, biases):
    """Pure-JAX reference with the same bf16-store / f32-accumulate plan."""
    n = x.shape[0]
    adj = build_normalized_adjacency(edge_index, n)[:n, :n]
    h = x.astype(jnp.bfloat16)
    num_layers = len(weights)
    for li, (w, b) in enumerate(zip(weights, biases)):
        p = jnp.dot(h, w.astype(jnp.bfloat16),
                    preferred_element_type=jnp.float32).astype(jnp.bfloat16)
        z = jnp.dot(adj, p, preferred_element_type=jnp.float32) + b.astype(jnp.float32)
        if li != num_layers - 1:
            h = jnp.maximum(z, 0.0).astype(jnp.bfloat16)
        else:
            h = jax.nn.log_softmax(z, axis=1)
    return h


if __name__ == "__main__":
    key = jax.random.PRNGKey(0)
    k_x, k_e1, k_e2 = jax.random.split(key, 3)

    # Small synthetic graph: N nodes, F input features, 3-layer GCN, C classes.
    N, F, H, C, E = 256, 16, 32, 4, 1024
    num_layers = 3

    x = jax.random.normal(k_x, (N, F), dtype=jnp.float32)
    src = jax.random.randint(k_e1, (E,), 0, N, dtype=jnp.int32)
    dst = jax.random.randint(k_e2, (E,), 0, N, dtype=jnp.int32)
    edge_index = jnp.stack([src, dst], axis=0)

    dims = [F] + [H] * (num_layers - 1) + [C]
    weights, biases = [], []
    for li in range(num_layers):
        kw = jax.random.fold_in(key, 100 + li)
        kb = jax.random.fold_in(key, 200 + li)
        d_in, d_out = dims[li], dims[li + 1]
        weights.append(
            jax.random.normal(kw, (d_in, d_out), dtype=jnp.float32) / jnp.sqrt(d_in)
        )
        biases.append(jax.random.normal(kb, (d_out,), dtype=jnp.float32) * 0.01)

    # A_hat is built once (hoisted out of the forward path) and reused.
    adj = build_normalized_adjacency(edge_index, N)

    # tm_cap=tk_cap=128 -> n_pad=256 gives a (2, 2) propagation grid:
    # exercises the tiled accumulating path (init/finalize + pipelined tiles)
    # and the fused next-layer projection epilogue.
    out = gnn_forward(x, adj, weights, biases, tm_cap=128, tk_cap=128)
    out = jax.block_until_ready(out)

    assert out.shape == (N, C)
    # log_softmax rows must exp-sum to 1
    row_sums = jnp.exp(out).sum(axis=1)
    assert jnp.allclose(row_sums, 1.0, atol=1e-4)
    # match a pure-JAX reference with the same precision plan
    ref = _reference_forward(x, edge_index, weights, biases)
    max_err = jnp.max(jnp.abs(out - ref))
    assert max_err < 2e-2, float(max_err)

    print("KERNEL_OK")
</pallas_src>

<mosaic_0001>
module attributes {stable_mosaic.version = 11 : i64} {
  func.func @_proj_kernel(%arg0: i32, %arg1: memref<128x16xbf16, #tpu.memory_space<vmem>>, %arg2: memref<16x128xbf16, #tpu.memory_space<vmem>>, %arg3: memref<128x128xbf16, #tpu.memory_space<vmem>>) attributes {dimension_semantics = [#tpu.dimension_semantics<parallel>], iteration_bounds = array<i64: 2>, scalar_prefetch = 0 : i64, scratch_operands = 0 : i64, tpu.core_type = #tpu.core_type<tc>, window_params = [{transform_indices = @transform_0, window_bounds = array<i64: 128, 16>}, {pipeline_mode = #tpu.pipeline_mode<synchronous>, transform_indices = @transform_1, window_bounds = array<i64: 16, 128>}, {transform_indices = @transform_2, window_bounds = array<i64: 128, 128>}]} {
    %c0 = arith.constant 0 : index
    %c0_0 = arith.constant 0 : index
    %0 = vector.load %arg1[%c0, %c0_0] : memref<128x16xbf16, #tpu.memory_space<vmem>>, vector<128x16xbf16>
    %c0_1 = arith.constant 0 : index
    %c0_2 = arith.constant 0 : index
    %1 = vector.load %arg2[%c0_1, %c0_2] : memref<16x128xbf16, #tpu.memory_space<vmem>>, vector<16x128xbf16>
    %cst = arith.constant dense<0.000000e+00> : vector<128x128xf32>
    %2 = tpu.matmul %0, %1, %cst {dimension_numbers = #tpu.dot_dimension_numbers<[1], [0], [0], [1], [0, 0, 1, 1], [], []>} : vector<128x16xbf16>, vector<16x128xbf16>, vector<128x128xf32> -> vector<128x128xf32>
    %3 = arith.truncf %2 : vector<128x128xf32> to vector<128x128xbf16>
    %c0_3 = arith.constant 0 : index
    %c0_4 = arith.constant 0 : index
    %4 = vector.load %arg3[%c0_3, %c0_4] : memref<128x128xbf16, #tpu.memory_space<vmem>>, vector<128x128xbf16>
    tpu.vector_store %arg3[%c0_3, %c0_4], %3 {strides = array<i32>} : memref<128x128xbf16, #tpu.memory_space<vmem>>, vector<128x128xbf16>,
    return
  }
  func.func @transform_0(%arg0: i32) -> (i32, i32) {
    %c0_i32 = arith.constant 0 : i32
    %c0_i32_0 = arith.constant 0 : i32
    return %arg0, %c0_i32 : i32, i32
  }
  func.func @transform_1(%arg0: i32) -> (i32, i32) {
    %c0_i32 = arith.constant 0 : i32
    %c0_i32_0 = arith.constant 0 : i32
    %c0_i32_1 = arith.constant 0 : i32
    return %c0_i32, %c0_i32_0 : i32, i32
  }
  func.func @transform_2(%arg0: i32) -> (i32, i32) {
    %c0_i32 = arith.constant 0 : i32
    %c0_i32_0 = arith.constant 0 : i32
    return %arg0, %c0_i32 : i32, i32
  }
}

</mosaic_0001>

<bundles_post_ra>
// kernel: tpu_custom_call.1
= control target key start
LH: loop header
LB: loop body
LE: loop exit
PB: predicated region body
PF: predicated region fallthrough
CT: control target
= control target key end

     0   :  { %7 = vsyncpa [#allocation3], 0  ;;  %s875_s0 = inlined_call_operand.vmem [shape: bf16[256,16], index: 0, kind: input, shape index: {}]   ;;  %s876_s1 = inlined_call_operand.vmem [shape: bf16[16,128], index: 1, kind: input, shape index: {}]   ;;  %s877_s2 = inlined_call_operand.hbm [shape: bf16[256,128], index: 2, kind: output, shape index: {}]  }
   0x1   :  { %9 = vsyncpa [#allocation3 + $0x1], 0  ;;  %s758_s9 = smov 0   ;;  %s760_s10 = smov 0  }
   0x2   :  { %s762_s11 = smov 0   ;;  %s764_s12 = smov 0  }
   0x3 LB: > { %s779_s13 = sadd.s32 4294967295, %s738_s12   ;;  %s488_s14 = sadd.s32 4294967294, %s738_s12   ;;  %s738_s12 = sphi %s764_s12, %s883_s12   ;;  %s734_s11 = sphi %s762_s11, %s882_s11   ;;  %s730_s10 = sphi %s760_s10, %s881_s10   ;;  %s726_s9 = sphi %s758_s9, %s880_s9  }
   0x4   : > { %s783_s15 = sadd.s32 1, %s738_s12   ;;  %s69_s16 = sadd.s32 1, %s734_s11 }
   0x5   : > { %s66_s17 = ssub.s32 %s738_s12, %s783_s15  ;;  %p79_p0 = scmp.ne.s32.totalorder %s734_s11, %s730_s10 }
   0x6   : > { %p67_p1 = scmp.eq.s32.totalorder %s66_s17, 0  ;;  %p80_p2 = scmp.eq.s32.totalorder %s779_s13, 1 }
   0x7   : > { %p85_p3 = scmp.ne.s32.totalorder %s730_s10, %s726_s9  ;;  %p86_p4 = scmp.eq.s32.totalorder %s488_s14, 1 }
   0x8   : > { %s794_s18 = scalar_select %p67_p1, %s734_s11, %s69_s16  }
   0x9   : > { %p796_p5 = por %p80_p2, %p79_p0  ;;  %p800_p6 = por %p86_p4, %p85_p3 }
   0xa   : > { %p491_p7 = scmp.ge.s32.totalorder %s738_s12, 1  ;;  %p116_p8 = scmp.lt.s32.totalorder %s738_s12, 3 }
   0xc   : > { %p117_p9 = pnand %p491_p7, %p116_p8 }
   0xd   : > { %v667_v0 = vld [vmem:[%s876_s1] sm:$0xff] (!%p117_p9)   ;;  %s493_s23 = sshll.u32 (!%p117_p9), %s779_s13, 4  ;;  %vm210_vm0 = vcmask (!%p117_p9), 130048   ;;  %s135_s28 = sand.u32 (!%p117_p9), 1, %s730_s10  }
   0xe   : > { %120 = sbr.rel (%p117_p9) target bundleno = 267 (0x10b), region = 28  ;;  %p139_p10 = scmp.lt.s32.totalorder (!%p117_p9), %s493_s23, 31  ;;  %606 = vmatprep.subr.bf16.mxu0 (!%p117_p9), %v667_v0  ;;  %624 = vmatprep.subr.bf16.mxu1 (!%p117_p9), %v667_v0 }
   0xf   : > { %607 = vmatpush3.bf16.msra.mxu0 (!%p117_p9), %v667_v0  ;;  %625 = vmatpush3.bf16.msra.mxu1 (!%p117_p9), %v667_v0  ;;  %s492_s29 = sshll.u32 (!%p117_p9), %s135_s28, 6  ;;  %s549_s3 = sshll.u32 (!%p117_p9), %s779_s13, 10 }
  0x10   : > { %s137_s30 = scalar_lea.vmem (!%p117_p9), [#allocation2], %s492_s29  ;;  %s828_s7 = scalar_lea.hbm (!%p117_p9), %s877_s2, %s549_s3 }
  0x11   : > { %s426_s4 = sshll.u32 (!%p117_p9), %s137_s30, 4  ;;  %s834_s8 = scalar_lea.sflag (!%p117_p9), [#allocation3], %s135_s28  ;;  %s830_s4 = int_to_ptr.vmem [resolvable:$true] %s426_s4 }
  0x12   : > { %s676_s13 = scalar_lea.vmem (!%p117_p9), %s830_s4, 1024  ;;  %s740_s14 = smov (!%p117_p9), [#allocation2]  }
  0x13   : > { %p677_p11 = scmp.ne.s32.totalorder (!%p117_p9), %s830_s4, %s676_s13  ;;  %s680_s16 = sshll.u32 (!%p117_p9), %s740_s14, 4  ;;  %s681_s16 = int_to_ptr.vmem [resolvable:$false] %s680_s16 }
  0x14   : > { %s682_s17 = scalar_lea.vmem (!%p117_p9), %s681_s16, 2048  ;;  %p683_p0 = scmp.lt.s32.totalorder (!%p117_p9), %s830_s4, %s681_s16 }
  0x15   : > { %s885_s23 = smov (!%p139_p10, %s493_s23), 31  ;;  %p678_p12 = pnand %p677_p11, %p796_p5 }
  0x16   : > { %s494_s24 = sshll.u32 %s885_s23, 2  ;;  %p684_p1 = scmp.lt.s32.totalorder %s682_s17, %s676_s13 }
  0x17   : > { %s142_s27 = scalar_lea.vmem %s875_s0, %s494_s24  ;;  %p679_p13 = pneg %p678_p12 }
  0x18   : > { %v668_v1 = vld [vmem:[%s142_s27] sm:$0xff]   ;;  %v670_v3 = vld [vmem:[%s142_s27 + $0x8] sm:$0xff]   ;;  %v672_v5 = vld [vmem:[%s142_s27 + $0x10] sm:$0xff]   ;;  %p685_p2 = por %p684_p1, %p683_p0 }
  0x19   : > { %v669_v2 = vld [vmem:[%s142_s27 + $0x20] sm:$0xff]   ;;  %608 = vmatprep.mubr.msk.bf16.mxu0 %vm210_vm0, %v668_v1  ;;  %v671_v4 = vld [vmem:[%s142_s27 + $0x28] sm:$0xff]   ;;  %v673_v6 = vld [vmem:[%s142_s27 + $0x30] sm:$0xff]  }
  0x1a   : > { %616 = vmatprep.mubr.msk.bf16.mxu1 %vm210_vm0, %v669_v2  ;;  %609 = vmatmul.mubr.msk.bf16.vlgmr.msra.gmra.mrb[0].mxu0 %vm210_vm0, %v670_v3  ;;  %v674_v7 = vld [vmem:[%s142_s27 + $0x18] sm:$0xff]   ;;  %p686_p3 = pnand %p685_p2, %p679_p13 }
  0x1b   : > { %617 = vmatmul.mubr.msk.bf16.vlgmr.msra.gmra.mrb[0].mxu1 %vm210_vm0, %v671_v4  ;;  %612 = vmatprep.mubr.msk.bf16.mxu0 %vm210_vm0, %v672_v5  ;;  %v675_v8 = vld [vmem:[%s142_s27 + $0x38] sm:$0xff]  }
  0x1c   : > { %620 = vmatprep.mubr.msk.bf16.mxu1 %vm210_vm0, %v673_v6 }
  0x22   : > { %613 = vmatmul.mubr.msk.bf16.gmra.mrb[4].mxu0 %vm210_vm0, %v674_v7 }
  0x23   : > { %621 = vmatmul.mubr.msk.bf16.gmra.mrb[4].mxu1 %vm210_vm0, %v675_v8 }
  0xed   : > { %v610_v9 = vpop.f32.mrb[0].mxu0 }
  0xee   : > { %v618_v10 = vpop.f32.mrb[0].mxu1  ;;  %v269_v11 = vpop.f32.mrb[1].mxu0 }
  0xef   : > { %v301_v12 = vpop.f32.mrb[1].mxu1  ;;  %v611_v13 = vpop.f32.mrb[2].mxu0 }
  0xf0   : > { %v558_v14 = vpack.c.bf16 %v611_v13, %v610_v9  ;;  %v619_v15 = vpop.f32.mrb[2].mxu1  ;;  %v272_v16 = vpop.f32.mrb[3].mxu0 }
  0xf1   : > { %v578_v17 = vpack.c.bf16 %v619_v15, %v618_v10  ;;  %v553_v18 = vpack.c.bf16 %v272_v16, %v269_v11  ;;  %v304_v19 = vpop.f32.mrb[3].mxu1 }
  0xf2   : > { %590 = vst [vmem:[%s137_s30 + $0x8] sm:$0xff] %v558_v14   ;;  %v573_v20 = vpack.c.bf16 %v304_v19, %v301_v12 }
  0xf3   : > { %594 = vst [vmem:[%s137_s30 + $0x28] sm:$0xff] %v578_v17   ;;  %554 = vst [vmem:[%s137_s30] sm:$0xff] %v553_v18  }
  0xf4   : > { %593 = vst [vmem:[%s137_s30 + $0x20] sm:$0xff] %v573_v20  }
  0xf5   : > { %v614_v21 = vpop.f32.mrb[4].mxu0 }
  0xf6   : > { %v622_v22 = vpop.f32.mrb[4].mxu1  ;;  %v285_v23 = vpop.f32.mrb[5].mxu0 }
  0xf7   : > { %v317_v24 = vpop.f32.mrb[5].mxu1  ;;  %v615_v25 = vpop.f32.mrb[6].mxu0 }
  0xf8   : > { %v568_v26 = vpack.c.bf16 %v615_v25, %v614_v21  ;;  %v623_v27 = vpop.f32.mrb[6].mxu1  ;;  %v288_v28 = vpop.f32.mrb[7].mxu0 }
  0xf9   : > { %v588_v29 = vpack.c.bf16 %v623_v27, %v622_v22  ;;  %v563_v30 = vpack.c.bf16 %v288_v28, %v285_v23  ;;  %v320_v31 = vpop.f32.mrb[7].mxu1 }
  0xfa   : > { %592 = vst [vmem:[%s137_s30 + $0x18] sm:$0xff] %v568_v26   ;;  %v583_v32 = vpack.c.bf16 %v320_v31, %v317_v24 }
  0xfb   : > { %596 = vst [vmem:[%s137_s30 + $0x38] sm:$0xff] %v588_v29   ;;  %591 = vst [vmem:[%s137_s30 + $0x10] sm:$0xff] %v563_v30  }
  0xfc   : > { %595 = vst [vmem:[%s137_s30 + $0x30] sm:$0xff] %v583_v32  }
  0xfd   : > { %689 = shalt.err (!%p686_p3)
}
  0xfe   : > { %s690_s21 = scalar_lea.hbm %s828_s7, 1024  ;;  %s694_s24 = scalar_lea.hbm %s877_s2, 2048 }
  0xff   : > { %p691_p4 = scmp.ne.s32.totalorder %s828_s7, %s690_s21  ;;  %p695_p9 = scmp.lt.u32.totalorder %s828_s7, %s877_s2 }
 0x100   : > { %p696_p10 = scmp.lt.u32.totalorder %s694_s24, %s690_s21  ;;  %p698_p12 = scmp.lt.u32.totalorder %s690_s21, %s828_s7 }
 0x101   : > { %p692_p7 = pnand %p691_p4, %p796_p5 }
 0x102   : > { %p697_p11 = por %p696_p10, %p695_p9 }
 0x103   : > { %p693_p8 = pneg %p692_p7 }
 0x104   : > { %p699_p13 = por %p698_p12, %p697_p11 }
 0x106   : > { %p700_p0 = pnand %p699_p13, %p693_p8 }
 0x108   : > { %703 = shalt.err (!%p700_p0)
}
 0x109   : > { %s741_s27 = smov 64   ;;  %s742_s28 = smov 4  }
 0x10a   : > { %626 = dma.vmem_to_hbm [thread:$0]  (%p796_p5), %s830_s4, 1024, %s828_s7, %s834_s8, %s741_s27, %s741_s27, %s742_s28  }
 0x10b PF: > { %p632_p1 = scmp.ge.s32.totalorder %s738_s12, 2  ;;  %s441_s29 = sand.u32 1, %s726_s9  }
 0x10c   : > { %s442_s30 = scalar_lea.sflag [#allocation3], %s441_s29 }
 0x10d   : > { %p629_p2 = pnand %p632_p1, %p800_p6 }
 0x10f   : > { %721 = dma.done.wait (!%p629_p2), %s442_s30, 1024  }
 0x110   : > { %723 = vsyncadd (!%p629_p2), %s442_s30, 4294966272  ;;  %p12_p3 = scmp.ge.s32.totalorder %s783_s15, 4   ;;  %s880_s9 = smov %s730_s10 }
 0x111   : > { %s881_s10 = smov %s734_s11  ;;  %s882_s11 = smov %s794_s18 }
 0x112   : > { %s883_s12 = smov %s783_s15  ;;  %14 = sbr.rel (!%p12_p3) target bundleno = 3 (0x3), region = 63 }
 0x119   :  { %447 = vsyncpa [#allocation3], 1 }
 0x11a   :  { %449 = vsyncpa [#allocation3 + $0x1], 1 }

</bundles_post_ra>
